<compile_context>
chip_gen: v6e
topology: v6e:2x2x1
jax: 0.10.0
libtpu: 0.0.40
codegen_flags: <defaults>
</compile_context>

<pallas_src>
import functools

import jax
import jax.numpy as jnp
from jax.experimental import pallas as pl
from jax.experimental.pallas import tpu as pltpu


def _round_up(x: int, m: int) -> int:
    return ((x + m - 1) // m) * m


def _largest_tile(padded: int, max_tile: int, fits, min_blocks: int = 1) -> int:
    """Largest multiple of 128 dividing `padded`, <= max_tile, passing `fits`."""
    best = 128
    for t in range(128, min(max_tile, padded) + 1, 128):
        if padded % t == 0 and padded // t >= min_blocks and fits(t):
            best = t
    return best


# ---------------- kernels ----------------

def _dot_exp_kernel(im_ref, sT_ref, out_ref, *, apply_exp: bool):
    """Full-K tile: one MXU contraction (+ optional exp), lane-dense store."""
    acc = jnp.dot(im_ref[...], sT_ref[...], preferred_element_type=jnp.float32)
    if apply_exp:
        acc = jnp.exp(acc)
    out_ref[...] = acc.astype(out_ref.dtype)


def _dot_exp_kloop_kernel(im_ref, sT_ref, out_ref, *, apply_exp: bool):
    """K-looped tile (huge K only): accumulate directly into the f32 output
    block (resident across the K axis), exp applied once at the last step."""
    k = pl.program_id(2)

    @pl.when(k == 0)
    def _init():
        out_ref[...] = jnp.zeros_like(out_ref)

    out_ref[...] += jnp.dot(im_ref[...], sT_ref[...],
                            preferred_element_type=jnp.float32)

    if apply_exp:
        @pl.when(k == pl.num_programs(2) - 1)
        def _finalize():
            out_ref[...] = jnp.exp(out_ref[...])


# ---------------- wrapper ----------------

_VMEM_BUDGET = 24 * 1024 * 1024  # conservative per-TC budget: OK on v5e/v6e/v7x


def similarity_pallas(im: jax.Array, s: jax.Array, *, apply_exp: bool = True,
                      out_dtype=jnp.float32,
                      vmem_budget_bytes: int = _VMEM_BUDGET) -> jax.Array:
    """exp(im @ s.T) (or plain im @ s.T) -> [n_im, n_s], Pallas TPU kernel."""
    n_im, d = im.shape
    n_s, d2 = s.shape
    assert d == d2, "embedding dims must match"

    isz = jnp.dtype(im.dtype).itemsize
    out_isz = jnp.dtype(out_dtype).itemsize

    mp = _round_up(n_im, 128)
    np_ = _round_up(n_s, 128)
    kp = _round_up(d, 128)

    # Pre-transpose s once -> standard (M,K)x(K,N) contraction on the MXU
    # (no per-tile XLU transpose of the RHS); amortized over all M tiles.
    sT = s.T  # (d, n_s)

    # Zero-pad only when needed (zeros don't change im @ s.T; padded rows/cols
    # are sliced away from the output).
    im_p = im if (mp == n_im and kp == d) else jnp.pad(im, ((0, mp - n_im), (0, kp - d)))
    sT_p = sT if (kp == d and np_ == n_s) else jnp.pad(sT, ((0, kp - d), (0, np_ - n_s)))

    min_blocks_m = 2 if mp >= 256 else 1  # keep both v7x TensorCores busy

    # VMEM footprints (double-buffer everything, conservative).
    def fp_resident(tm):      # s fully resident, full K
        return 2 * tm * kp * isz + 2 * kp * np_ * isz + 2 * tm * np_ * out_isz

    def fp_2d(tm, tn):        # (M, N) grid, full K
        return 2 * tm * kp * isz + 2 * kp * tn * isz + 2 * tm * tn * out_isz

    def fp_3d(tm, tn, tk):    # (M, N, K) grid, f32 output is the accumulator
        return 2 * tm * tk * isz + 2 * tk * tn * isz + 2 * tm * tn * 4

    if fp_resident(128) <= vmem_budget_bytes:
        # ---- fast path: s resident in VMEM, full K, 1-D grid over M ----
        tm = _largest_tile(mp, 1024,
                           lambda t: fp_resident(t) <= vmem_budget_bytes,
                           min_blocks_m)
        grid = (mp // tm,)
        kernel = functools.partial(_dot_exp_kernel, apply_exp=apply_exp)
        in_specs = [
            pl.BlockSpec((tm, kp), lambda i: (i, 0)),
            pl.BlockSpec((kp, np_), lambda i: (0, 0)),  # constant -> DMA'd once
        ]
        out_specs = pl.BlockSpec((tm, np_), lambda i: (i, 0))
        dim_sem = ("parallel",)
        needed = fp_resident(tm)
        call_out_dtype = out_dtype
    elif fp_2d(128, 128) <= vmem_budget_bytes:
        # ---- (M, N) grid, full K (typical embedding dims fit) ----
        tm = _largest_tile(mp, 512,
                           lambda t: fp_2d(t, 128) <= vmem_budget_bytes,
                           min_blocks_m)
        tn = _largest_tile(np_, 512,
                           lambda t: fp_2d(tm, t) <= vmem_budget_bytes)
        grid = (mp // tm, np_ // tn)
        kernel = functools.partial(_dot_exp_kernel, apply_exp=apply_exp)
        in_specs = [
            pl.BlockSpec((tm, kp), lambda i, j: (i, 0)),
            pl.BlockSpec((kp, tn), lambda i, j: (0, j)),
        ]
        out_specs = pl.BlockSpec((tm, tn), lambda i, j: (i, j))
        dim_sem = ("parallel", "parallel")
        needed = fp_2d(tm, tn)
        call_out_dtype = out_dtype
    else:
        # ---- huge K: 3-D grid, accumulate into the f32 output block ----
        tm = tn = 256 if (mp % 256 == 0 and np_ % 256 == 0) else 128
        tk = _largest_tile(kp, 4096,
                           lambda t: fp_3d(tm, tn, t) <= vmem_budget_bytes)
        grid = (mp // tm, np_ // tn, kp // tk)
        kernel = functools.partial(_dot_exp_kloop_kernel, apply_exp=apply_exp)
        in_specs = [
            pl.BlockSpec((tm, tk), lambda i, j, k: (i, k)),
            pl.BlockSpec((tk, tn), lambda i, j, k: (k, j)),
        ]
        out_specs = pl.BlockSpec((tm, tn), lambda i, j, k: (i, j))
        dim_sem = ("parallel", "parallel", "arbitrary")
        needed = fp_3d(tm, tn, tk)
        call_out_dtype = jnp.float32  # output block doubles as accumulator

    cost = pl.CostEstimate(
        flops=2 * mp * np_ * kp,
        transcendentals=mp * np_ if apply_exp else 0,
        bytes_accessed=mp * kp * isz + kp * np_ * isz + mp * np_ * out_isz,
    )

    out_padded = pl.pallas_call(
        kernel,
        out_shape=jax.ShapeDtypeStruct((mp, np_), call_out_dtype),
        grid=grid,
        in_specs=in_specs,
        out_specs=out_specs,
        compiler_params=pltpu.CompilerParams(
            dimension_semantics=dim_sem,
            vmem_limit_bytes=int(needed) + 8 * 1024 * 1024,  # footprint + headroom
        ),
        cost_estimate=cost,
    )(im_p, sT_p)

    out = out_padded[:n_im, :n_s]
    if out.dtype != jnp.dtype(out_dtype):
        out = out.astype(out_dtype)
    return out


class ContrastiveLossPallas:
    """JAX/Pallas port of ContrastiveLoss forward.

    Only the forward-pass compute present in the reference module is
    implemented: score = sim(im, s). Negative sampling / margin / loss
    reduction are never reached in the reference forward.
    """

    def __init__(self, margin=0, measure='exp', neg_sampling='random',
                 cost_style='sum', direction='all'):
        self.progressive_counter = 0
        self.margin = margin
        self.cost_style = cost_style
        self.direction = direction
        self.neg_sampling = neg_sampling
        self.measure = measure
        # TODO(synk): a fused variant could keep the score tile in VMEM and emit
        # only per-row loss partials, removing the N x N HBM writeback entirely.

    def forward(self, s, im):
        if self.measure == 'exp':
            score = similarity_pallas(im, s, apply_exp=True)
        elif self.measure == 'order':
            # TODO(synk): order_sim needs a broadcast-diff/clamp reduction kernel;
            # plain-JAX fallback for now.
            ymx = s[:, None, :] - im[None, :, :]
            score = -jnp.sqrt(jnp.sum(jnp.maximum(ymx, 0.0) ** 2, axis=2)).T
        elif self.measure == 'euclidean':
            # TODO(synk): euclidean_sim not kernelized; plain-JAX fallback.
            ymx = s[:, None, :] - im[None, :, :]
            score = -jnp.sum(ymx ** 2, axis=2).T
        else:  # 'cosine' in the reference is a plain dot product (no exp, no log)
            score = similarity_pallas(im, s, apply_exp=False)
        self.progressive_counter += 1
        return score  # reference forward computes (and discards) this


if __name__ == "__main__":
    key = jax.random.PRNGKey(0)
    k_im, k_s = jax.random.split(key)

    # Small shapes: 8 image embeddings, 8 sentence embeddings, hidden=32.
    # Scale 0.1 keeps exp() well-conditioned for the numeric check.
    n_im, n_s, hidden = 8, 8, 32
    im = 0.1 * jax.random.normal(k_im, (n_im, hidden), dtype=jnp.float32)
    s = 0.1 * jax.random.normal(k_s, (n_s, hidden), dtype=jnp.float32)

    loss_mod = ContrastiveLossPallas(margin=0, measure='exp')
    score = jax.block_until_ready(loss_mod.forward(s, im))

    ref = jnp.exp(im @ s.T)
    assert score.shape == (n_im, n_s)
    assert score.dtype == jnp.float32
    assert jnp.allclose(score, ref, rtol=2e-2, atol=2e-3), "exp-sim mismatch vs reference"

    cos_mod = ContrastiveLossPallas(margin=0, measure='cosine')
    cos = jax.block_until_ready(cos_mod.forward(s, im))
    assert jnp.allclose(cos, im @ s.T, rtol=2e-2, atol=2e-3), "cosine-sim mismatch vs reference"

    print("KERNEL_OK")
</pallas_src>

<mosaic_0001>
module attributes {stable_mosaic.version = 11 : i64} {
  func.func @_dot_exp_kernel(%arg0: i32, %arg1: memref<128x128xf32, #tpu.memory_space<vmem>>, %arg2: memref<128x128xf32, #tpu.memory_space<vmem>>, %arg3: memref<128x128xf32, #tpu.memory_space<vmem>>) attributes {dimension_semantics = [#tpu.dimension_semantics<parallel>], iteration_bounds = array<i64: 1>, scalar_prefetch = 0 : i64, scratch_operands = 0 : i64, tpu.core_type = #tpu.core_type<tc>, window_params = [{transform_indices = @transform_0, window_bounds = array<i64: 128, 128>}, {pipeline_mode = #tpu.pipeline_mode<synchronous>, transform_indices = @transform_1, window_bounds = array<i64: 128, 128>}, {transform_indices = @transform_2, window_bounds = array<i64: 128, 128>}]} {
    %c0 = arith.constant 0 : index
    %c0_0 = arith.constant 0 : index
    %0 = vector.load %arg1[%c0, %c0_0] : memref<128x128xf32, #tpu.memory_space<vmem>>, vector<128x128xf32>
    %c0_1 = arith.constant 0 : index
    %c0_2 = arith.constant 0 : index
    %1 = vector.load %arg2[%c0_1, %c0_2] : memref<128x128xf32, #tpu.memory_space<vmem>>, vector<128x128xf32>
    %cst = arith.constant dense<0.000000e+00> : vector<128x128xf32>
    %2 = tpu.matmul %0, %1, %cst {dimension_numbers = #tpu.dot_dimension_numbers<[1], [0], [0], [1], [0, 0, 1, 1], [], []>} : vector<128x128xf32>, vector<128x128xf32>, vector<128x128xf32> -> vector<128x128xf32>
    %3 = math.exp %2 : vector<128x128xf32>
    %c0_3 = arith.constant 0 : index
    %c0_4 = arith.constant 0 : index
    %4 = vector.load %arg3[%c0_3, %c0_4] : memref<128x128xf32, #tpu.memory_space<vmem>>, vector<128x128xf32>
    tpu.vector_store %arg3[%c0_3, %c0_4], %3 {strides = array<i32>} : memref<128x128xf32, #tpu.memory_space<vmem>>, vector<128x128xf32>,
    return
  }
  func.func @transform_0(%arg0: i32) -> (i32, i32) {
    %c0_i32 = arith.constant 0 : i32
    %c0_i32_0 = arith.constant 0 : i32
    return %arg0, %c0_i32 : i32, i32
  }
  func.func @transform_1(%arg0: i32) -> (i32, i32) {
    %c0_i32 = arith.constant 0 : i32
    %c0_i32_0 = arith.constant 0 : i32
    %c0_i32_1 = arith.constant 0 : i32
    return %c0_i32, %c0_i32_0 : i32, i32
  }
  func.func @transform_2(%arg0: i32) -> (i32, i32) {
    %c0_i32 = arith.constant 0 : i32
    %c0_i32_0 = arith.constant 0 : i32
    return %arg0, %c0_i32 : i32, i32
  }
}

</mosaic_0001>

<bundles_post_ra>
// kernel: tpu_custom_call.1
= control target key start
LH: loop header
LB: loop body
LE: loop exit
PB: predicated region body
PF: predicated region fallthrough
CT: control target
= control target key end

     0   :  { %7 = vsyncpa [#allocation3], 0  ;;  %s544_s0 = inlined_call_operand.hbm [shape: f32[128,128], index: 0, kind: input, shape index: {}]   ;;  %s545_s1 = inlined_call_operand.hbm [shape: f32[128,128], index: 1, kind: input, shape index: {}]   ;;  %s546_s2 = inlined_call_operand.hbm [shape: f32[128,128], index: 2, kind: output, shape index: {}]  }
   0x1   :  { %8 = vsyncpa [#allocation6], 0 }
   0x2   :  { %9 = vsyncpa [#allocation4], 0  ;;  %s506_s9 = smov [#allocation2]  }
   0x3   :  { %s15_s10 = sshll.u32 %s506_s9, 4  ;;  %s16_s10 = int_to_ptr.vmem [resolvable:$true] %s15_s10 }
   0x4   :  { %s448_s11 = scalar_lea.vmem %s16_s10, 2048  ;;  %p453_p1 = scmp.lt.s32.totalorder %s16_s10, %s16_s10 }
   0x5   :  { %p449_p0 = scmp.ne.s32.totalorder %s16_s10, %s448_s11  ;;  %p454_p2 = scmp.lt.s32.totalorder %s448_s11, %s448_s11 }
   0x7   :  { %p455_p3 = por %p454_p2, %p453_p1 }
   0x9   :  { %p456_p4 = pnand %p455_p3, %p449_p0 }
   0xb   :  { %459 = shalt.err (!%p456_p4)
}
   0xc   :  { %s507_s12 = smov 128   ;;  %s508_s13 = smov 8  }
   0xd   :  { %21 = dma.hbm_to_vmem [thread:$0]  %s544_s0, 2048, %s16_s10, [#allocation3], %s507_s12, %s507_s12, %s508_s13  }
   0xe   :  { %s509_s16 = smov [#allocation5]  }
   0xf   :  { %s27_s17 = sshll.u32 %s509_s16, 4  ;;  %s28_s17 = int_to_ptr.vmem [resolvable:$true] %s27_s17 }
  0x10   :  { %s468_s18 = scalar_lea.vmem %s28_s17, 2048  ;;  %p473_p6 = scmp.lt.s32.totalorder %s28_s17, %s28_s17 }
  0x11   :  { %p469_p5 = scmp.ne.s32.totalorder %s28_s17, %s468_s18  ;;  %p474_p7 = scmp.lt.s32.totalorder %s468_s18, %s468_s18 }
  0x13   :  { %p475_p8 = por %p474_p7, %p473_p6 }
  0x15   :  { %p476_p9 = pnand %p475_p8, %p469_p5 }
  0x17   :  { %479 = shalt.err (!%p476_p9)
}
  0x18   :  { %33 = dma.hbm_to_vmem [thread:$0]  %s545_s1, 2048, %s28_s17, [#allocation6], %s507_s12, %s507_s12, %s508_s13  }
  0x19   :  { %500 = dma.done.wait [#allocation3], 2048  }
  0x1a   :  { %501 = vsyncadd [#allocation3], 4294965248 }
  0x1b   :  { %502 = dma.done.wait [#allocation6], 2048  }
  0x1c   :  { %503 = vsyncadd [#allocation6], 4294965248  ;;  %v71_v0 = vld [vmem:[#allocation5 + $0x78] sm:$0xff]  ;;  %v70_v1 = vld [vmem:[#allocation5 + $0x70] sm:$0xff]  ;;  %s510_s0 = smov [#allocation7]  }
  0x1d   :  { %315 = vmatprep.subr.mxu0 %v71_v0  ;;  %371 = vmatprep.subr.mxu1 %v71_v0  ;;  %v69_v2 = vld [vmem:[#allocation5 + $0x68] sm:$0xff]  ;;  %v68_v3 = vld [vmem:[#allocation5 + $0x60] sm:$0xff]  ;;  %v67_v4 = vld [vmem:[#allocation5 + $0x58] sm:$0xff]  ;;  %s270_s1 = sshll.u32 %s510_s0, 4  ;;  %s271_s1 = int_to_ptr.vmem [resolvable:$true] %s270_s1 }
  0x1e   :  { %316 = vmatpush3.msra.mxu0 %v71_v0  ;;  %387 = vmatpush3.msra.mxu1 %v71_v0  ;;  %v66_v5 = vld [vmem:[#allocation5 + $0x50] sm:$0xff]  ;;  %v65_v6 = vld [vmem:[#allocation5 + $0x48] sm:$0xff]  ;;  %v64_v7 = vld [vmem:[#allocation5 + $0x40] sm:$0xff]  ;;  %s480_s21 = scalar_lea.vmem %s271_s1, 2048  ;;  %p485_p11 = scmp.lt.s32.totalorder %s271_s1, %s271_s1 }
  0x1f   :  { %317 = vmatprep.subr.mxu0 %v70_v1  ;;  %372 = vmatprep.subr.mxu1 %v70_v1  ;;  %v63_v8 = vld [vmem:[#allocation5 + $0x38] sm:$0xff]  ;;  %v62_v9 = vld [vmem:[#allocation5 + $0x30] sm:$0xff]  ;;  %v61_v10 = vld [vmem:[#allocation5 + $0x28] sm:$0xff]  ;;  %p481_p10 = scmp.ne.s32.totalorder %s271_s1, %s480_s21  ;;  %p486_p12 = scmp.lt.s32.totalorder %s480_s21, %s480_s21 }
  0x20   :  { %318 = vmatpush3.msra.mxu0 %v70_v1  ;;  %388 = vmatpush3.msra.mxu1 %v70_v1  ;;  %v60_v11 = vld [vmem:[#allocation5 + $0x20] sm:$0xff]  ;;  %v59_v12 = vld [vmem:[#allocation5 + $0x18] sm:$0xff]  ;;  %v58_v13 = vld [vmem:[#allocation5 + $0x10] sm:$0xff] }
  0x21   :  { %319 = vmatprep.subr.mxu0 %v69_v2  ;;  %373 = vmatprep.subr.mxu1 %v69_v2  ;;  %v57_v14 = vld [vmem:[#allocation5 + $0x8] sm:$0xff]  ;;  %v56_v15 = vld [vmem:[#allocation5] sm:$0xff]  ;;  %v42_v20 = vld [vmem:[#allocation2 + $0x10] sm:$0xff]  ;;  %p487_p13 = por %p486_p12, %p485_p11 }
  0x22   :  { %320 = vmatpush3.msra.mxu0 %v69_v2  ;;  %389 = vmatpush3.msra.mxu1 %v69_v2  ;;  %v40_v16 = vld [vmem:[#allocation2] sm:$0xff]  ;;  %v41_v18 = vld [vmem:[#allocation2 + $0x8] sm:$0xff]  ;;  %v50_v21 = vld [vmem:[#allocation2 + $0x50] sm:$0xff] }
  0x23   :  { %321 = vmatprep.subr.mxu0 %v68_v3  ;;  %374 = vmatprep.subr.mxu1 %v68_v3  ;;  %v48_v17 = vld [vmem:[#allocation2 + $0x40] sm:$0xff]  ;;  %v49_v19 = vld [vmem:[#allocation2 + $0x48] sm:$0xff]  ;;  %v43_v22 = vld [vmem:[#allocation2 + $0x18] sm:$0xff]  ;;  %p488_p0 = pnand %p487_p13, %p481_p10 }
  0x24   :  { %322 = vmatpush3.msra.mxu0 %v68_v3  ;;  %390 = vmatpush3.msra.mxu1 %v68_v3  ;;  %v51_v23 = vld [vmem:[#allocation2 + $0x58] sm:$0xff]  ;;  %v44_v24 = vld [vmem:[#allocation2 + $0x20] sm:$0xff]  ;;  %v45_v26 = vld [vmem:[#allocation2 + $0x28] sm:$0xff] }
  0x25   :  { %323 = vmatprep.subr.mxu0 %v67_v4  ;;  %375 = vmatprep.subr.mxu1 %v67_v4  ;;  %v52_v25 = vld [vmem:[#allocation2 + $0x60] sm:$0xff]  ;;  %v53_v27 = vld [vmem:[#allocation2 + $0x68] sm:$0xff]  ;;  %v46_v28 = vld [vmem:[#allocation2 + $0x30] sm:$0xff] }
  0x26   :  { %324 = vmatpush3.msra.mxu0 %v67_v4  ;;  %391 = vmatpush3.msra.mxu1 %v67_v4  ;;  %v54_v29 = vld [vmem:[#allocation2 + $0x70] sm:$0xff]  ;;  %v47_v30 = vld [vmem:[#allocation2 + $0x38] sm:$0xff] }
  0x27   :  { %325 = vmatprep.subr.mxu0 %v66_v5  ;;  %376 = vmatprep.subr.mxu1 %v66_v5  ;;  %v55_v31 = vld [vmem:[#allocation2 + $0x78] sm:$0xff] }
  0x28   :  { %326 = vmatpush3.msra.mxu0 %v66_v5  ;;  %392 = vmatpush3.msra.mxu1 %v66_v5 }
  0x29   :  { %327 = vmatprep.subr.mxu0 %v65_v6  ;;  %377 = vmatprep.subr.mxu1 %v65_v6 }
  0x2a   :  { %328 = vmatpush3.msra.mxu0 %v65_v6  ;;  %393 = vmatpush3.msra.mxu1 %v65_v6 }
  0x2b   :  { %329 = vmatprep.subr.mxu0 %v64_v7  ;;  %378 = vmatprep.subr.mxu1 %v64_v7 }
  0x2c   :  { %330 = vmatpush3.msra.mxu0 %v64_v7  ;;  %394 = vmatpush3.msra.mxu1 %v64_v7 }
  0x2d   :  { %331 = vmatprep.subr.mxu0 %v63_v8  ;;  %379 = vmatprep.subr.mxu1 %v63_v8 }
  0x2e   :  { %332 = vmatpush3.msra.mxu0 %v63_v8  ;;  %395 = vmatpush3.msra.mxu1 %v63_v8 }
  0x2f   :  { %333 = vmatprep.subr.mxu0 %v62_v9  ;;  %380 = vmatprep.subr.mxu1 %v62_v9 }
  0x30   :  { %334 = vmatpush3.msra.mxu0 %v62_v9  ;;  %396 = vmatpush3.msra.mxu1 %v62_v9 }
  0x31   :  { %335 = vmatprep.subr.mxu0 %v61_v10  ;;  %381 = vmatprep.subr.mxu1 %v61_v10 }
  0x32   :  { %336 = vmatpush3.msra.mxu0 %v61_v10  ;;  %397 = vmatpush3.msra.mxu1 %v61_v10 }
  0x33   :  { %337 = vmatprep.subr.mxu0 %v60_v11  ;;  %382 = vmatprep.subr.mxu1 %v60_v11 }
  0x34   :  { %338 = vmatpush3.msra.mxu0 %v60_v11  ;;  %398 = vmatpush3.msra.mxu1 %v60_v11 }
  0x35   :  { %339 = vmatprep.subr.mxu0 %v59_v12  ;;  %383 = vmatprep.subr.mxu1 %v59_v12 }
  0x36   :  { %340 = vmatpush3.msra.mxu0 %v59_v12  ;;  %399 = vmatpush3.msra.mxu1 %v59_v12 }
  0x37   :  { %341 = vmatprep.subr.mxu0 %v58_v13  ;;  %384 = vmatprep.subr.mxu1 %v58_v13 }
  0x38   :  { %342 = vmatpush3.msra.mxu0 %v58_v13  ;;  %400 = vmatpush3.msra.mxu1 %v58_v13 }
  0x39   :  { %343 = vmatprep.subr.mxu0 %v57_v14  ;;  %385 = vmatprep.subr.mxu1 %v57_v14 }
  0x3a   :  { %344 = vmatpush3.msra.mxu0 %v57_v14  ;;  %401 = vmatpush3.msra.mxu1 %v57_v14 }
  0x3b   :  { %345 = vmatprep.subr.mxu0 %v56_v15  ;;  %386 = vmatprep.subr.mxu1 %v56_v15 }
  0x3c   :  { %346 = vmatpush3.msra.mxu0 %v56_v15  ;;  %402 = vmatpush3.msra.mxu1 %v56_v15 }
  0x3d   :  { %347 = vmatprep.mubr.f32.mxu0 %v40_v16  ;;  %359 = vmatprep.mubr.f32.mxu1 %v48_v17 }
  0x3e   :  { %348 = vmatmul.mubr.f32.vlgmr.msra.gmra.mxu0 %v41_v18  ;;  %360 = vmatmul.mubr.f32.vlgmr.msra.gmra.mxu1 %v49_v19 }
  0x3f   :  { %350 = vmatprep.mubr.f32.mxu0 %v42_v20  ;;  %362 = vmatprep.mubr.f32.mxu1 %v50_v21 }
  0x42   :  { %351 = vmatmul.mubr.f32.gmra.mxu0 %v43_v22  ;;  %363 = vmatmul.mubr.f32.gmra.mxu1 %v51_v23 }
  0x43   :  { %353 = vmatprep.mubr.f32.mxu0 %v44_v24  ;;  %365 = vmatprep.mubr.f32.mxu1 %v52_v25 }
  0x46   :  { %354 = vmatmul.mubr.f32.gmra.mxu0 %v45_v26  ;;  %366 = vmatmul.mubr.f32.gmra.mxu1 %v53_v27 }
  0x47   :  { %356 = vmatprep.mubr.f32.mxu0 %v46_v28  ;;  %368 = vmatprep.mubr.f32.mxu1 %v54_v29 }
  0x4a   :  { %357 = vmatmul.mubr.f32.gmra.mxu0 %v47_v30  ;;  %369 = vmatmul.mubr.f32.gmra.mxu1 %v55_v31 }
  0xfe   :  { %v349_v32 = vpop.f32.mrf.mxu0  ;;  %v361_v33 = vpop.f32.mrf.mxu1 }
  0xff   :  { %v219_v34 = vmul.f32 1.442695, %v349_v32  ;;  %v235_v35 = vmul.f32 1.442695, %v361_v33 }
 0x100   :  { %v138_v36 = vpop.f32.mrf.mxu0  ;;  %v178_v37 = vpop.f32.mrf.mxu1 }
 0x101   :  { %408 = vpow2.f32 %v219_v34  ;;  %v217_v38 = vmul.f32 1.442695, %v138_v36  ;;  %v233_v39 = vmul.f32 1.442695, %v178_v37 }
 0x102   :  { %410 = vpow2.f32 %v235_v35  ;;  %v352_v40 = vpop.f32.mrf.mxu0  ;;  %v364_v41 = vpop.f32.mrf.mxu1 }
 0x103   :  { %412 = vpow2.f32 %v217_v38  ;;  %v223_v42 = vmul.f32 1.442695, %v352_v40  ;;  %v239_v43 = vmul.f32 1.442695, %v364_v41 }
 0x104   :  { %414 = vpow2.f32 %v233_v39  ;;  %v148_v44 = vpop.f32.mrf.mxu0  ;;  %v188_v45 = vpop.f32.mrf.mxu1 }
 0x105   :  { %416 = vpow2.f32 %v223_v42  ;;  %v221_v46 = vmul.f32 1.442695, %v148_v44  ;;  %v237_v47 = vmul.f32 1.442695, %v188_v45 }
 0x106   :  { %418 = vpow2.f32 %v239_v43  ;;  %v355_v48 = vpop.f32.mrf.mxu0  ;;  %v367_v49 = vpop.f32.mrf.mxu1 }
 0x107   :  { %420 = vpow2.f32 %v221_v46  ;;  %v227_v50 = vmul.f32 1.442695, %v355_v48  ;;  %v243_v51 = vmul.f32 1.442695, %v367_v49 }
 0x108   :  { %422 = vpow2.f32 %v237_v47  ;;  %v158_v52 = vpop.f32.mrf.mxu0  ;;  %v198_v53 = vpop.f32.mrf.mxu1 }
 0x109   :  { %424 = vpow2.f32 %v227_v50  ;;  %v225_v54 = vmul.f32 1.442695, %v158_v52  ;;  %v241_v55 = vmul.f32 1.442695, %v198_v53 }
 0x10a   :  { %426 = vpow2.f32 %v243_v51  ;;  %v358_v56 = vpop.f32.mrf.mxu0  ;;  %v370_v57 = vpop.f32.mrf.mxu1 }
 0x10b   :  { %428 = vpow2.f32 %v225_v54  ;;  %v231_v58 = vmul.f32 1.442695, %v358_v56  ;;  %v247_v59 = vmul.f32 1.442695, %v370_v57 }
 0x10c   :  { %430 = vpow2.f32 %v241_v55  ;;  %v168_v60 = vpop.f32.mrf.mxu0  ;;  %v208_v61 = vpop.f32.mrf.mxu1 }
 0x10d   :  { %432 = vpow2.f32 %v231_v58  ;;  %v229_v62 = vmul.f32 1.442695, %v168_v60  ;;  %v245_v63 = vmul.f32 1.442695, %v208_v61 }
 0x10e   :  { %v409_v0 = vpop.eup %408  ;;  %434 = vpow2.f32 %v247_v59 }
 0x10f   :  { %v411_v1 = vpop.eup %410  ;;  %250 = vst [vmem:[#allocation7 + $0x8] sm:$0xff] %v409_v0  ;;  %436 = vpow2.f32 %v229_v62 }
 0x110   :  { %v413_v2 = vpop.eup %412  ;;  %258 = vst [vmem:[#allocation7 + $0x48] sm:$0xff] %v411_v1  ;;  %438 = vpow2.f32 %v245_v63 }
 0x111   :  { %v415_v3 = vpop.eup %414  ;;  %249 = vst [vmem:[#allocation7] sm:$0xff] %v413_v2 }
 0x112   :  { %v417_v4 = vpop.eup %416  ;;  %257 = vst [vmem:[#allocation7 + $0x40] sm:$0xff] %v415_v3 }
 0x113   :  { %v419_v5 = vpop.eup %418  ;;  %252 = vst [vmem:[#allocation7 + $0x18] sm:$0xff] %v417_v4 }
 0x114   :  { %v421_v6 = vpop.eup %420  ;;  %260 = vst [vmem:[#allocation7 + $0x58] sm:$0xff] %v419_v5 }
 0x115   :  { %v423_v7 = vpop.eup %422  ;;  %251 = vst [vmem:[#allocation7 + $0x10] sm:$0xff] %v421_v6 }
 0x116   :  { %v425_v8 = vpop.eup %424  ;;  %259 = vst [vmem:[#allocation7 + $0x50] sm:$0xff] %v423_v7 }
 0x117   :  { %v427_v9 = vpop.eup %426  ;;  %254 = vst [vmem:[#allocation7 + $0x28] sm:$0xff] %v425_v8 }
 0x118   :  { %v429_v10 = vpop.eup %428  ;;  %262 = vst [vmem:[#allocation7 + $0x68] sm:$0xff] %v427_v9 }
 0x119   :  { %v431_v11 = vpop.eup %430  ;;  %253 = vst [vmem:[#allocation7 + $0x20] sm:$0xff] %v429_v10 }
 0x11a   :  { %v433_v12 = vpop.eup %432  ;;  %261 = vst [vmem:[#allocation7 + $0x60] sm:$0xff] %v431_v11 }
 0x11b   :  { %v435_v13 = vpop.eup %434  ;;  %256 = vst [vmem:[#allocation7 + $0x38] sm:$0xff] %v433_v12 }
 0x11c   :  { %v437_v14 = vpop.eup %436  ;;  %264 = vst [vmem:[#allocation7 + $0x78] sm:$0xff] %v435_v13 }
 0x11d   :  { %v439_v15 = vpop.eup %438  ;;  %255 = vst [vmem:[#allocation7 + $0x30] sm:$0xff] %v437_v14 }
 0x11e   :  { %263 = vst [vmem:[#allocation7 + $0x70] sm:$0xff] %v439_v15 }
 0x11f   :  { %491 = shalt.err (!%p488_p0)
}
 0x120   :  { %276 = dma.vmem_to_hbm [thread:$0]  %s271_s1, 2048, %s546_s2, [#allocation4], %s507_s12, %s507_s12, %s508_s13  }
 0x121   :  { %504 = dma.done.wait [#allocation4], 2048  }
 0x122   :  { %505 = vsyncadd [#allocation4], 4294965248 }
 0x123   :  { %280 = vsyncpa [#allocation3], 1 }
 0x124   :  { %281 = vsyncpa [#allocation6], 1 }
 0x125   :  { %282 = vsyncpa [#allocation4], 1 }

</bundles_post_ra>
